<compile_context>
chip_gen: v6e
topology: v6e:2x2x1
jax: 0.10.0
libtpu: 0.0.40
codegen_flags: <defaults>
</compile_context>

<pallas_src>
import functools

import jax
import jax.numpy as jnp
from jax.experimental import pallas as pl
from jax.experimental.pallas import tpu as pltpu


# ----------------------------------------------------------------------------
# Kernel: one grid step processes `batch_block` batch elements.
#   x*_ref : (R, HW) f32, R = batch_block * C   (rows = (batch, channel))
#   w_ref  : (R, >=128) f32 packed parameter slab (see _pack_param_slab)
#   o_ref  : (R, HW) f32
# ----------------------------------------------------------------------------
def _csaf_kernel(x0_ref, x2_ref, x4_ref, w_ref, o_ref, *, hw, mid, col):
    x0 = x0_ref[...]                                     # (R, HW)
    x2 = x2_ref[...]
    x4 = x4_ref[...]
    w = w_ref[...]                                       # (R, 128) slab
    r = w.shape[0]

    # --- squeeze: global average pool over the lane-dense spatial axis ------
    inv_hw = jnp.float32(1.0 / hw)
    m0 = jnp.sum(x0, axis=1, keepdims=True) * inv_hw     # (R, 1)
    m2 = jnp.sum(x2, axis=1, keepdims=True) * inv_hw
    m4 = jnp.sum(x4, axis=1, keepdims=True) * inv_hw

    # --- static slices out of the packed slab (stay in vregs) ---------------
    w1a0 = w[:, col["w1a0"]:col["w1a0"] + mid]           # (R, mid)
    w1a2 = w[:, col["w1a2"]:col["w1a2"] + mid]
    w1a4 = w[:, col["w1a4"]:col["w1a4"] + mid]
    seg = w[:, col["seg"]:col["seg"] + r]                # (R, R) block-diag ones
    w2 = w[0:mid, col["w2"]:col["w2"] + mid]             # (mid, mid)
    b1 = w[0:1, col["b1"]:col["b1"] + mid]               # (1, mid)
    b2 = w[0:1, col["b2"]:col["b2"] + mid]               # (1, mid)
    w3r0 = w[:, col["w3r0"]:col["w3r0"] + mid]           # (R, mid)
    w3r2 = w[:, col["w3r2"]:col["w3r2"] + mid]
    w3r4 = w[:, col["w3r4"]:col["w3r4"] + mid]
    b3 = w[:, col["b3"]:col["b3"] + 3]                   # (R, 3), one col/branch

    # --- excitation MLP entirely on the VPU (no MXU, no concat) -------------
    # layer 1: per-row partial products, then per-batch channel sum via mask
    p = m0 * w1a0 + m2 * w1a2 + m4 * w1a4                # (R, mid)
    h1 = jnp.sum(seg[:, :, None] * p[None, :, :], axis=1) + b1
    h1 = jnp.maximum(h1, 0.0)                            # (R, mid), rows repeat per batch
    # layer 2: row-wise h1 @ W2^T
    h2 = jnp.sum(h1[:, None, :] * w2[None, :, :], axis=2) + b2
    h2 = jnp.maximum(h2, 0.0)                            # (R, mid)
    # layer 3 + sigmoid: one gate per (batch, channel) row, per branch
    g0 = jax.nn.sigmoid(jnp.sum(w3r0 * h2, axis=1, keepdims=True) + b3[:, 0:1])
    g2 = jax.nn.sigmoid(jnp.sum(w3r2 * h2, axis=1, keepdims=True) + b3[:, 1:2])
    g4 = jax.nn.sigmoid(jnp.sum(w3r4 * h2, axis=1, keepdims=True) + b3[:, 2:3])

    # --- channel-wise gating, single lane-dense store ------------------------
    o_ref[...] = x0 * g0 + x2 * g2 + x4 * g4


# ----------------------------------------------------------------------------
# Pack all CSAF parameters into one (batch_block*C, >=128) f32 slab.
#   w1a{0,2,4}[b*C+ch, j] = W1[j, branch*C + ch]   (layer-1 per-row factors)
#   seg                   = block-diag ones        (per-batch channel sum)
#   w3r{0,2,4}[b*C+ch, j] = W3[branch*C + ch, j]
#   b3[b*C+ch, branch]    = b3_vec[branch*C + ch]
# ----------------------------------------------------------------------------
def _pack_param_slab(params, batch_block, c):
    in_ch = 3 * c
    mid = params["w1"].shape[0]
    r = batch_block * c
    assert r >= mid, "slab rows must cover the hidden width"

    w1 = params["w1"].reshape(mid, in_ch).astype(jnp.float32)
    w2 = params["w2"].reshape(mid, mid).astype(jnp.float32)
    w3 = params["w3"].reshape(in_ch, mid).astype(jnp.float32)
    b1 = params["b1"].astype(jnp.float32)
    b2 = params["b2"].astype(jnp.float32)
    b3 = params["b3"].astype(jnp.float32)

    tile_rows = lambda a: jnp.tile(a, (batch_block, 1))   # (C, mid) -> (R, mid)

    pieces, col, off = [], {}, 0

    def add(name, arr):
        nonlocal off
        arr = jnp.asarray(arr, jnp.float32)
        if arr.shape[0] < r:
            arr = jnp.pad(arr, ((0, r - arr.shape[0]), (0, 0)))
        col[name] = off
        pieces.append(arr)
        off += arr.shape[1]

    add("w1a0", tile_rows(w1[:, 0:c].T))
    add("w1a2", tile_rows(w1[:, c:2 * c].T))
    add("w1a4", tile_rows(w1[:, 2 * c:3 * c].T))
    add("seg", jnp.kron(jnp.eye(batch_block, dtype=jnp.float32),
                        jnp.ones((c, c), jnp.float32)))
    add("w2", w2)
    add("b1", b1.reshape(1, mid))
    add("b2", b2.reshape(1, mid))
    add("w3r0", tile_rows(w3[0:c, :]))
    add("w3r2", tile_rows(w3[c:2 * c, :]))
    add("w3r4", tile_rows(w3[2 * c:3 * c, :]))
    add("b3", jnp.stack([jnp.tile(b3[0:c], batch_block),
                         jnp.tile(b3[c:2 * c], batch_block),
                         jnp.tile(b3[2 * c:3 * c], batch_block)], axis=1))

    slab = jnp.concatenate(pieces, axis=1)
    pad = (-slab.shape[1]) % 128                          # lane-align the slab
    if pad:
        slab = jnp.pad(slab, ((0, 0), (0, pad)))
    return slab, col, mid


# ----------------------------------------------------------------------------
# Wrapper: NCHW in / NCHW out, PyTorch-shaped 1x1-conv weights (Cout, Cin, 1, 1).
# batch_block=None -> whole batch in a single grid step (best for small N).
# For large N, pass batch_block so batch_block*C is a multiple of 8; the
# "parallel" grid axis then spreads blocks across TensorCores (v7x).
# ----------------------------------------------------------------------------
def csaf_forward(params, x0, x2, x4, *, batch_block=None):
    n, c, h, w = x0.shape
    hw = h * w
    if batch_block is None:
        batch_block = n
    assert n % batch_block == 0
    nblk = n // batch_block
    r = batch_block * c
    if nblk > 1:
        assert r % 8 == 0, "partial batch blocks must be sublane (8) aligned"

    x0f = x0.reshape(n * c, hw)
    x2f = x2.reshape(n * c, hw)
    x4f = x4.reshape(n * c, hw)

    slab, col, mid = _pack_param_slab(params, batch_block, c)

    x_spec = pl.BlockSpec((r, hw), lambda i: (i, 0))
    w_spec = pl.BlockSpec(slab.shape, lambda i: (0, 0))   # resident across steps

    out = pl.pallas_call(
        functools.partial(_csaf_kernel, hw=hw, mid=mid, col=col),
        out_shape=jax.ShapeDtypeStruct((n * c, hw), jnp.float32),
        grid=(nblk,),
        in_specs=[x_spec, x_spec, x_spec, w_spec],
        out_specs=pl.BlockSpec((r, hw), lambda i: (i, 0)),
        compiler_params=pltpu.CompilerParams(
            dimension_semantics=("parallel",)),
    )(x0f, x2f, x4f, slab)

    return out.reshape(n, c, h, w)


# ----------------------------------------------------------------------------
# Pure-JAX reference (mirrors the PyTorch forward) for a correctness check.
# ----------------------------------------------------------------------------
def csaf_reference(params, x0, x2, x4):
    def squeeze(x):
        return jnp.mean(x, axis=(2, 3))                   # (N, C)

    s = jnp.concatenate([squeeze(x0), squeeze(x2), squeeze(x4)], axis=1)
    w1 = params["w1"][:, :, 0, 0]
    w2 = params["w2"][:, :, 0, 0]
    w3 = params["w3"][:, :, 0, 0]
    h = jax.nn.relu(s @ w1.T + params["b1"])
    h = jax.nn.relu(h @ w2.T + params["b2"])
    g = jax.nn.sigmoid(h @ w3.T + params["b3"])           # (N, 3C)
    c = x0.shape[1]
    g0 = g[:, :c][:, :, None, None]
    g2 = g[:, c:2 * c][:, :, None, None]
    g4 = g[:, 2 * c:][:, :, None, None]
    return x0 * g0 + x2 * g2 + x4 * g4


# ----------------------------------------------------------------------------
if __name__ == "__main__":
    key = jax.random.PRNGKey(0)
    k_params, k0, k2, k4 = jax.random.split(key, 4)

    batch, c, h, w = 2, 4, 16, 16          # each branch input: (2, 4, 16, 16)
    in_ch, ratio = 3 * c, 4                # CSAF(in_chnls=12, ratio=4)
    mid = in_ch // ratio

    kw1, kb1, kw2, kb2, kw3, kb3 = jax.random.split(k_params, 6)
    params = {
        # PyTorch 1x1-conv weight layout: (Cout, Cin, 1, 1), bias: (Cout,)
        "w1": jax.random.normal(kw1, (mid, in_ch, 1, 1), jnp.float32)
              / jnp.sqrt(in_ch),
        "b1": jax.random.normal(kb1, (mid,), jnp.float32) * 0.01,
        "w2": jax.random.normal(kw2, (mid, mid, 1, 1), jnp.float32)
              / jnp.sqrt(mid),
        "b2": jax.random.normal(kb2, (mid,), jnp.float32) * 0.01,
        "w3": jax.random.normal(kw3, (in_ch, mid, 1, 1), jnp.float32)
              / jnp.sqrt(mid),
        "b3": jax.random.normal(kb3, (in_ch,), jnp.float32) * 0.01,
    }

    x0 = jax.random.normal(k0, (batch, c, h, w), jnp.float32)
    x2 = jax.random.normal(k2, (batch, c, h, w), jnp.float32)
    x4 = jax.random.normal(k4, (batch, c, h, w), jnp.float32)

    fwd = jax.jit(csaf_forward)
    out = fwd(params, x0, x2, x4)
    jax.block_until_ready(out)

    ref = csaf_reference(params, x0, x2, x4)
    assert out.shape == (batch, c, h, w), out.shape
    assert out.dtype == jnp.float32
    max_err = float(jnp.max(jnp.abs(out - ref)))
    assert max_err < 1e-4, f"mismatch vs reference: {max_err}"

    print("KERNEL_OK")
</pallas_src>

<mosaic_0001>
module attributes {stable_mosaic.version = 11 : i64} {
  func.func @_csaf_kernel(%arg0: i32, %arg1: memref<8x256xf32, #tpu.memory_space<vmem>>, %arg2: memref<8x256xf32, #tpu.memory_space<vmem>>, %arg3: memref<8x256xf32, #tpu.memory_space<vmem>>, %arg4: memref<8x128xf32, #tpu.memory_space<vmem>>, %arg5: memref<8x256xf32, #tpu.memory_space<vmem>>) attributes {dimension_semantics = [#tpu.dimension_semantics<parallel>], iteration_bounds = array<i64: 1>, scalar_prefetch = 0 : i64, scratch_operands = 0 : i64, tpu.core_type = #tpu.core_type<tc>, window_params = [{transform_indices = @transform_0, window_bounds = array<i64: 8, 256>}, {transform_indices = @transform_1, window_bounds = array<i64: 8, 256>}, {transform_indices = @transform_2, window_bounds = array<i64: 8, 256>}, {pipeline_mode = #tpu.pipeline_mode<synchronous>, transform_indices = @transform_3, window_bounds = array<i64: 8, 128>}, {transform_indices = @transform_4, window_bounds = array<i64: 8, 256>}]} {
    %c0 = arith.constant 0 : index
    %c0_0 = arith.constant 0 : index
    %0 = vector.load %arg1[%c0, %c0_0] : memref<8x256xf32, #tpu.memory_space<vmem>>, vector<8x256xf32>
    %c0_1 = arith.constant 0 : index
    %c0_2 = arith.constant 0 : index
    %1 = vector.load %arg2[%c0_1, %c0_2] : memref<8x256xf32, #tpu.memory_space<vmem>>, vector<8x256xf32>
    %c0_3 = arith.constant 0 : index
    %c0_4 = arith.constant 0 : index
    %2 = vector.load %arg3[%c0_3, %c0_4] : memref<8x256xf32, #tpu.memory_space<vmem>>, vector<8x256xf32>
    %c0_5 = arith.constant 0 : index
    %c0_6 = arith.constant 0 : index
    %3 = vector.load %arg4[%c0_5, %c0_6] : memref<8x128xf32, #tpu.memory_space<vmem>>, vector<8x128xf32>
    %cst = arith.constant dense<0.000000e+00> : vector<8xf32>
    %4 = vector.multi_reduction <add>, %0, %cst [1] : vector<8x256xf32> to vector<8xf32>
    %5 = vector.shape_cast %4 : vector<8xf32> to vector<8x1xf32>
    %cst_7 = arith.constant 3.906250e-03 : f32
    %6 = vector.broadcast %cst_7 : f32 to vector<8x1xf32>
    %7 = arith.mulf %5, %6 : vector<8x1xf32>
    %cst_8 = arith.constant dense<0.000000e+00> : vector<8xf32>
    %8 = vector.multi_reduction <add>, %1, %cst_8 [1] : vector<8x256xf32> to vector<8xf32>
    %9 = vector.shape_cast %8 : vector<8xf32> to vector<8x1xf32>
    %cst_9 = arith.constant 3.906250e-03 : f32
    %10 = vector.broadcast %cst_9 : f32 to vector<8x1xf32>
    %11 = arith.mulf %9, %10 : vector<8x1xf32>
    %cst_10 = arith.constant dense<0.000000e+00> : vector<8xf32>
    %12 = vector.multi_reduction <add>, %2, %cst_10 [1] : vector<8x256xf32> to vector<8xf32>
    %13 = vector.shape_cast %12 : vector<8xf32> to vector<8x1xf32>
    %cst_11 = arith.constant 3.906250e-03 : f32
    %14 = vector.broadcast %cst_11 : f32 to vector<8x1xf32>
    %15 = arith.mulf %13, %14 : vector<8x1xf32>
    %16 = vector.extract_strided_slice %3 {offsets = [0, 0], sizes = [8, 3], strides = [1, 1]} : vector<8x128xf32> to vector<8x3xf32>
    %17 = vector.extract_strided_slice %3 {offsets = [0, 3], sizes = [8, 3], strides = [1, 1]} : vector<8x128xf32> to vector<8x3xf32>
    %18 = vector.extract_strided_slice %3 {offsets = [0, 6], sizes = [8, 3], strides = [1, 1]} : vector<8x128xf32> to vector<8x3xf32>
    %19 = vector.extract_strided_slice %3 {offsets = [0, 9], sizes = [8, 8], strides = [1, 1]} : vector<8x128xf32> to vector<8x8xf32>
    %20 = vector.extract_strided_slice %3 {offsets = [0, 17], sizes = [3, 3], strides = [1, 1]} : vector<8x128xf32> to vector<3x3xf32>
    %21 = vector.extract_strided_slice %3 {offsets = [0, 20], sizes = [1, 3], strides = [1, 1]} : vector<8x128xf32> to vector<1x3xf32>
    %22 = vector.extract_strided_slice %3 {offsets = [0, 23], sizes = [1, 3], strides = [1, 1]} : vector<8x128xf32> to vector<1x3xf32>
    %23 = vector.extract_strided_slice %3 {offsets = [0, 26], sizes = [8, 3], strides = [1, 1]} : vector<8x128xf32> to vector<8x3xf32>
    %24 = vector.extract_strided_slice %3 {offsets = [0, 29], sizes = [8, 3], strides = [1, 1]} : vector<8x128xf32> to vector<8x3xf32>
    %25 = vector.extract_strided_slice %3 {offsets = [0, 32], sizes = [8, 3], strides = [1, 1]} : vector<8x128xf32> to vector<8x3xf32>
    %26 = vector.extract_strided_slice %3 {offsets = [0, 35], sizes = [8, 3], strides = [1, 1]} : vector<8x128xf32> to vector<8x3xf32>
    %27 = vector.broadcast %7 : vector<8x1xf32> to vector<8x3xf32>
    %28 = arith.mulf %27, %16 : vector<8x3xf32>
    %29 = vector.broadcast %11 : vector<8x1xf32> to vector<8x3xf32>
    %30 = arith.mulf %29, %17 : vector<8x3xf32>
    %31 = arith.addf %28, %30 : vector<8x3xf32>
    %32 = vector.broadcast %15 : vector<8x1xf32> to vector<8x3xf32>
    %33 = arith.mulf %32, %18 : vector<8x3xf32>
    %34 = arith.addf %31, %33 : vector<8x3xf32>
    %35 = vector.shape_cast %19 : vector<8x8xf32> to vector<8x8x1xf32>
    %36 = vector.shape_cast %34 : vector<8x3xf32> to vector<1x8x3xf32>
    %37 = vector.broadcast %35 : vector<8x8x1xf32> to vector<8x8x3xf32>
    %38 = vector.broadcast %36 : vector<1x8x3xf32> to vector<8x8x3xf32>
    %39 = arith.mulf %37, %38 : vector<8x8x3xf32>
    %cst_12 = arith.constant dense<0.000000e+00> : vector<8x3xf32>
    %40 = vector.multi_reduction <add>, %39, %cst_12 [1] : vector<8x8x3xf32> to vector<8x3xf32>
    %41 = vector.broadcast %21 : vector<1x3xf32> to vector<8x3xf32>
    %42 = arith.addf %40, %41 : vector<8x3xf32>
    %cst_13 = arith.constant 0.000000e+00 : f32
    %43 = vector.broadcast %cst_13 : f32 to vector<8x3xf32>
    %44 = arith.maximumf %42, %43 : vector<8x3xf32>
    %45 = vector.shape_cast %44 : vector<8x3xf32> to vector<8x1x3xf32>
    %46 = vector.shape_cast %20 : vector<3x3xf32> to vector<1x3x3xf32>
    %47 = vector.broadcast %45 : vector<8x1x3xf32> to vector<8x3x3xf32>
    %48 = vector.broadcast %46 : vector<1x3x3xf32> to vector<8x3x3xf32>
    %49 = arith.mulf %47, %48 : vector<8x3x3xf32>
    %cst_14 = arith.constant dense<0.000000e+00> : vector<8x3xf32>
    %50 = vector.multi_reduction <add>, %49, %cst_14 [2] : vector<8x3x3xf32> to vector<8x3xf32>
    %51 = vector.broadcast %22 : vector<1x3xf32> to vector<8x3xf32>
    %52 = arith.addf %50, %51 : vector<8x3xf32>
    %cst_15 = arith.constant 0.000000e+00 : f32
    %53 = vector.broadcast %cst_15 : f32 to vector<8x3xf32>
    %54 = arith.maximumf %52, %53 : vector<8x3xf32>
    %55 = arith.mulf %23, %54 : vector<8x3xf32>
    %cst_16 = arith.constant dense<0.000000e+00> : vector<8xf32>
    %56 = vector.multi_reduction <add>, %55, %cst_16 [1] : vector<8x3xf32> to vector<8xf32>
    %57 = vector.shape_cast %56 : vector<8xf32> to vector<8x1xf32>
    %58 = vector.extract_strided_slice %26 {offsets = [0, 0], sizes = [8, 1], strides = [1, 1]} : vector<8x3xf32> to vector<8x1xf32>
    %59 = arith.addf %57, %58 : vector<8x1xf32>
    %60 = arith.negf %59 : vector<8x1xf32>
    %61 = math.exp %60 : vector<8x1xf32>
    %cst_17 = arith.constant 1.000000e+00 : f32
    %62 = vector.broadcast %cst_17 : f32 to vector<8x1xf32>
    %63 = arith.addf %62, %61 : vector<8x1xf32>
    %64 = arith.divf %62, %63 : vector<8x1xf32>
    %65 = arith.mulf %24, %54 : vector<8x3xf32>
    %cst_18 = arith.constant dense<0.000000e+00> : vector<8xf32>
    %66 = vector.multi_reduction <add>, %65, %cst_18 [1] : vector<8x3xf32> to vector<8xf32>
    %67 = vector.shape_cast %66 : vector<8xf32> to vector<8x1xf32>
    %68 = vector.extract_strided_slice %26 {offsets = [0, 1], sizes = [8, 1], strides = [1, 1]} : vector<8x3xf32> to vector<8x1xf32>
    %69 = arith.addf %67, %68 : vector<8x1xf32>
    %70 = arith.negf %69 : vector<8x1xf32>
    %71 = math.exp %70 : vector<8x1xf32>
    %cst_19 = arith.constant 1.000000e+00 : f32
    %72 = vector.broadcast %cst_19 : f32 to vector<8x1xf32>
    %73 = arith.addf %72, %71 : vector<8x1xf32>
    %74 = arith.divf %72, %73 : vector<8x1xf32>
    %75 = arith.mulf %25, %54 : vector<8x3xf32>
    %cst_20 = arith.constant dense<0.000000e+00> : vector<8xf32>
    %76 = vector.multi_reduction <add>, %75, %cst_20 [1] : vector<8x3xf32> to vector<8xf32>
    %77 = vector.shape_cast %76 : vector<8xf32> to vector<8x1xf32>
    %78 = vector.extract_strided_slice %26 {offsets = [0, 2], sizes = [8, 1], strides = [1, 1]} : vector<8x3xf32> to vector<8x1xf32>
    %79 = arith.addf %77, %78 : vector<8x1xf32>
    %80 = arith.negf %79 : vector<8x1xf32>
    %81 = math.exp %80 : vector<8x1xf32>
    %cst_21 = arith.constant 1.000000e+00 : f32
    %82 = vector.broadcast %cst_21 : f32 to vector<8x1xf32>
    %83 = arith.addf %82, %81 : vector<8x1xf32>
    %84 = arith.divf %82, %83 : vector<8x1xf32>
    %85 = vector.broadcast %64 : vector<8x1xf32> to vector<8x256xf32>
    %86 = arith.mulf %0, %85 : vector<8x256xf32>
    %87 = vector.broadcast %74 : vector<8x1xf32> to vector<8x256xf32>
    %88 = arith.mulf %1, %87 : vector<8x256xf32>
    %89 = arith.addf %86, %88 : vector<8x256xf32>
    %90 = vector.broadcast %84 : vector<8x1xf32> to vector<8x256xf32>
    %91 = arith.mulf %2, %90 : vector<8x256xf32>
    %92 = arith.addf %89, %91 : vector<8x256xf32>
    %c0_22 = arith.constant 0 : index
    %c0_23 = arith.constant 0 : index
    %93 = vector.load %arg5[%c0_22, %c0_23] : memref<8x256xf32, #tpu.memory_space<vmem>>, vector<8x256xf32>
    tpu.vector_store %arg5[%c0_22, %c0_23], %92 {strides = array<i32>} : memref<8x256xf32, #tpu.memory_space<vmem>>, vector<8x256xf32>,
    return
  }
  func.func @transform_0(%arg0: i32) -> (i32, i32) {
    %c0_i32 = arith.constant 0 : i32
    %c0_i32_0 = arith.constant 0 : i32
    return %arg0, %c0_i32 : i32, i32
  }
  func.func @transform_1(%arg0: i32) -> (i32, i32) {
    %c0_i32 = arith.constant 0 : i32
    %c0_i32_0 = arith.constant 0 : i32
    return %arg0, %c0_i32 : i32, i32
  }
  func.func @transform_2(%arg0: i32) -> (i32, i32) {
    %c0_i32 = arith.constant 0 : i32
    %c0_i32_0 = arith.constant 0 : i32
    return %arg0, %c0_i32 : i32, i32
  }
  func.func @transform_3(%arg0: i32) -> (i32, i32) {
    %c0_i32 = arith.constant 0 : i32
    %c0_i32_0 = arith.constant 0 : i32
    %c0_i32_1 = arith.constant 0 : i32
    return %c0_i32, %c0_i32_0 : i32, i32
  }
  func.func @transform_4(%arg0: i32) -> (i32, i32) {
    %c0_i32 = arith.constant 0 : i32
    %c0_i32_0 = arith.constant 0 : i32
    return %arg0, %c0_i32 : i32, i32
  }
}

</mosaic_0001>

<bundles_post_ra>
// kernel: tile.86
= control target key start
LH: loop header
LB: loop body
LE: loop exit
PB: predicated region body
PF: predicated region fallthrough
CT: control target
= control target key end

     0   :  { %s22_s0 = inlined_call_operand.vmem [shape: f32[4], index: 0, kind: input, shape index: {}]   ;;  %s23_s1 = inlined_call_operand.vmem [shape: f32[2,4], index: 1, kind: output, shape index: {}]  }
   0x1   :  { %v4_v0 = vld [vmem:[%s22_s0] ss:$0 sm:$0xff] }
   0x2   :  { %5 = vst [vmem:[%s23_s1] sm:$0x3] %v4_v0 }

// kernel: tile.0
= control target key start
LH: loop header
LB: loop body
LE: loop exit
PB: predicated region body
PF: predicated region fallthrough
CT: control target
= control target key end

     0   :  { %s35_s8 = smov 125   ;;  %vm8_vm0 = vcmask 7168   ;;  %s36_s11 = smov 126   ;;  %s62_s0 = inlined_call_operand.vmem [shape: f32[2,4], index: 0, kind: input, shape index: {}]   ;;  %s63_s1 = inlined_call_operand.vmem [shape: f32[8,1], index: 1, kind: output, shape index: {}]  }
   0x1   :  { %v5_v0 = vld [vmem:[%s62_s0] sm:$0x3]  ;;  %s34_s0 = smov 127  }
   0x2   :  { %6 = vst [vmem:[#allocation0] sm:$0x3] %v5_v0 }
   0x9   :  { %v10_v1 = vld [vmem:[#allocation0] sm:$0x3]  }
   0xa   :  { %v22_v2 = vld [vmem:[#allocation0] sm:$0x3]   ;;  %11 = vrot.lane.b32.xlu0 %v10_v1, %s34_s0 }
   0xb   :  { %23 = vrot.lane.b32.xlu1 %v22_v2, %s35_s8  ;;  %v7_v3 = vld [vmem:[#allocation0] sm:$0x3]  }
   0xc   :  { %v16_v4 = vld [vmem:[#allocation0] sm:$0x3]   ;;  %9 = vst.msk [vmem:[%s63_s1] ss:$4 sm:$0x3] %vm8_vm0, %v7_v3  }
   0xe   :  { %17 = vrot.lane.b32.xlu0 %v16_v4, %s36_s11 }
  0x7c   :  { %v12_v5 = vpop.permute.xlu0 %11  }
  0x7d   :  { %v24_v6 = vpop.permute.xlu1 %23   ;;  %28 = vst.msk [vmem:[%s63_s1 + $0x1] ss:$4 sm:$0x3] %vm8_vm0, %v12_v5  }
  0x7e   :  { %30 = vst.msk [vmem:[%s63_s1 + $0x3] ss:$4 sm:$0x3] %vm8_vm0, %v24_v6  }
  0x80   :  { %v18_v7 = vpop.permute.xlu0 %17  }
  0x81   :  { %29 = vst.msk [vmem:[%s63_s1 + $0x2] ss:$4 sm:$0x3] %vm8_vm0, %v18_v7  }

// kernel: csaf_forward.1
= control target key start
LH: loop header
LB: loop body
LE: loop exit
PB: predicated region body
PF: predicated region fallthrough
CT: control target
= control target key end

     0   :  { %v49_v9 = vlaneseq  ;;  %s562_s27 = smov 108   ;;  %s563_s28 = smov 111   ;;  %vm121_vm0 = vcmask 23552   ;;  %vm242_vm1 = vcmask 18432   ;;  %vm355_vm2 = vcmask 1041409   ;;  %s738_s1 = inlined_call_operand.vmem [shape: f32[8,256], index: 1, kind: input, shape index: {}]   ;;  %s739_s2 = inlined_call_operand.vmem [shape: f32[8,256], index: 2, kind: input, shape index: {}]   ;;  %s740_s0 = inlined_call_operand.vmem [shape: f32[8,256], index: 0, kind: input, shape index: {}]   ;;  %s741_s3 = inlined_call_operand.vmem [shape: f32[8,128], index: 3, kind: input, shape index: {}]   ;;  %s742_s4 = inlined_call_operand.vmem [shape: f32[8,256], index: 4, kind: output, shape index: {}]  }
   0x1   :  { %v599_v0 = vld [vmem:[%s738_s1] sm:$0xff]  ;;  %v604_v1 = vld [vmem:[%s738_s1 + $0x8] sm:$0xff]  ;;  %vm357_vm3 = vcmask 1042434   ;;  %vm359_vm4 = vcmask 1043459   ;;  %vm361_vm5 = vcmask 1044484   ;;  %vm363_vm6 = vcmask 1045509  }
   0x2   :  { %v609_v2 = vld [vmem:[%s739_s2] sm:$0xff]  ;;  %v28_v3 = vadd.f32 %v604_v1, %v599_v0  ;;  %v616_v4 = vld [vmem:[%s739_s2 + $0x8] sm:$0xff]  ;;  %v633_v10 = vshrl.u32 %v49_v9, 7  ;;  %vm365_vm7 = vcmask 1046534   ;;  %vm367_vm8 = vcmask 1047559   ;;  %s565_s29 = smov 99  }
   0x3   :  { %v621_v5 = vld [vmem:[%s740_s0] sm:$0xff]  ;;  %v626_v6 = vld [vmem:[%s740_s0 + $0x8] sm:$0xff]  ;;  %v32_v8 = vadd.f32 %v616_v4, %v609_v2  ;;  %s560_s0 = smov 125   ;;  %s566_s30 = smov 102  }
   0x4   :  { %v24_v7 = vadd.f32 %v626_v6, %v621_v5  ;;  %29 = vadd.xlane.f32.xlu0 %v28_v3  ;;  %v636_v11 = vsub.s32 0, %v633_v10  ;;  %v641_v12 = vld [vmem:[%s741_s3] sm:$0xff]  ;;  %v59_v14 = vsub.s32 1, %v633_v10  ;;  %v75_v16 = vsub.s32 3, %v633_v10  ;;  %s561_s3 = smov 122   ;;  %s567_s5 = smov 96  }
   0x5   :  { %v67_v20 = vsub.s32 2, %v633_v10  ;;  %v91_v25 = vsub.s32 5, %v633_v10  ;;  %v83_v26 = vsub.s32 4, %v633_v10  ;;  %v107_v30 = vsub.s32 7, %v633_v10 }
   0x6   :  { %25 = vadd.xlane.f32.xlu1 %v24_v7  ;;  %v645_v13 = vrot.slane %v641_v12, %v636_v11  ;;  %v60_v15 = vrot.slane %v641_v12, %v59_v14  ;;  %v76_v17 = vrot.slane %v641_v12, %v75_v16  ;;  %v99_v31 = vsub.s32 6, %v633_v10 }
   0x7   :  { %v68_v24 = vrot.slane %v641_v12, %v67_v20  ;;  %v92_v28 = vrot.slane %v641_v12, %v91_v25  ;;  %v84_v29 = vrot.slane %v641_v12, %v83_v26  ;;  %v108_v32 = vrot.slane %v641_v12, %v107_v30 }
   0x8   :  { %33 = vadd.xlane.f32.xlu0 %v32_v8  ;;  %v100_v33 = vrot.slane %v641_v12, %v99_v31 }
  0x17   :  { %55 = vbcast.lane.b32.xlu1 %v645_v13, 265 }
  0x1b   :  { %63 = vbcast.lane.b32.xlu1 %v60_v15, 265 }
  0x1e   :  { %79 = vbcast.lane.b32.xlu0 %v76_v17, 265 }
  0x8d   :  { %v30_v18 = vpop.xlane.xlu0 %29 }
  0x8e   :  { %v31_v19 = vmul.f32 0.00390625, %v30_v18 }
  0x8f   :  { %v26_v34 = vpop.xlane.xlu1 %25 }
  0x90   :  { %v37_v21 = vmul.f32 %v31_v19, %v641_v12  ;;  %v27_v37 = vmul.f32 0.00390625, %v26_v34 }
  0x91   :  { %v34_v22 = vpop.xlane.xlu0 %33 }
  0x92   :  { %v35_v23 = vmul.f32 0.00390625, %v34_v22  ;;  %39 = vrot.lane.b32.xlu1 %v37_v21, %s560_s0  ;;  %v36_v40 = vmul.f32 %v27_v37, %v641_v12 }
  0x93   :  { %v56_v35 = vpop.permute.xlu1 %55 }
  0x94   :  { %v43_v27 = vmul.f32 %v35_v23, %v641_v12 }
  0x95   :  { %v80_v38 = vpop.permute.xlu0 %79 }
  0x96   :  { %45 = vrot.lane.b32.xlu0 %v43_v27, %s561_s3  ;;  %71 = vbcast.lane.b32.xlu1 %v68_v24, 265 }
  0x97   :  { %v64_v36 = vpop.permute.xlu1 %63 }
  0x9a   :  { %95 = vbcast.lane.b32.xlu0 %v92_v28, 265  ;;  %87 = vbcast.lane.b32.xlu1 %v84_v29, 265 }
  0x9e   :  { %111 = vbcast.lane.b32.xlu0 %v108_v32, 265  ;;  %103 = vbcast.lane.b32.xlu1 %v100_v33, 265 }
  0xa2   :  { %179 = vrot.lane.b32.xlu1 %v645_v13, %s562_s27  ;;  %231 = vrot.lane.b32.xlu0 %v641_v12, %s563_s28 }
 0x104   :  { %v40_v39 = vpop.permute.xlu1 %39 }
 0x105   :  { %v42_v41 = vadd.f32 %v40_v39, %v36_v40 }
 0x108   :  { %v46_v42 = vpop.permute.xlu0 %45  ;;  %v72_v43 = vpop.permute.xlu1 %71 }
 0x109   :  { %v48_v44 = vadd.f32 %v46_v42, %v42_v41 }
 0x10b   :  { %v115_v45 = vmul.f32 %v72_v43, %v48_v44  ;;  %v114_v46 = vmul.f32 %v64_v36, %v48_v44  ;;  %v113_v47 = vmul.f32 %v56_v35, %v48_v44  ;;  %v116_v48 = vmul.f32 %v80_v38, %v48_v44 }
 0x10c   :  { %v96_v49 = vpop.permute.xlu0 %95  ;;  %v88_v50 = vpop.permute.xlu1 %87 }
 0x10d   :  { %v136_v51 = vsel %vm121_vm0, %v115_v45, 0.0  ;;  %v118_v52 = vmul.f32 %v96_v49, %v48_v44  ;;  %v117_v53 = vmul.f32 %v88_v50, %v48_v44  ;;  %v129_v54 = vsel %vm121_vm0, %v114_v46, 0.0 }
 0x10e   :  { %v137_v55 = vrot.slane %v136_v51, 4  ;;  %v130_v56 = vrot.slane %v129_v54, 4  ;;  %v122_v57 = vsel %vm121_vm0, %v113_v47, 0.0  ;;  %v143_v58 = vsel %vm121_vm0, %v116_v48, 0.0 }
 0x10f   :  { %v157_v59 = vsel %vm121_vm0, %v118_v52, 0.0  ;;  %v150_v60 = vsel %vm121_vm0, %v117_v53, 0.0  ;;  %v123_v61 = vrot.slane %v122_v57, 4  ;;  %v144_v62 = vrot.slane %v143_v58, 4 }
 0x110   :  { %v138_v63 = vadd.f32 %v137_v55, %v136_v51  ;;  %v158_v3 = vrot.slane %v157_v59, 4  ;;  %v151_v7 = vrot.slane %v150_v60, 4  ;;  %v112_v8 = vpop.permute.xlu0 %111  ;;  %v104_v14 = vpop.permute.xlu1 %103  ;;  %v131_v15 = vadd.f32 %v130_v56, %v129_v54 }
 0x111   :  { %v120_v16 = vmul.f32 %v112_v8, %v48_v44  ;;  %v119_v17 = vmul.f32 %v104_v14, %v48_v44  ;;  %v124_v18 = vadd.f32 %v123_v61, %v122_v57  ;;  %v145_v19 = vadd.f32 %v144_v62, %v143_v58 }
 0x112   :  { %v139_v20 = vrot.slane %v138_v63, 2  ;;  %v159_v21 = vadd.f32 %v158_v3, %v157_v59  ;;  %v152_v22 = vadd.f32 %v151_v7, %v150_v60  ;;  %v132_v23 = vrot.slane %v131_v15, 2 }
 0x113   :  { %v171_v24 = vsel %vm121_vm0, %v120_v16, 0.0  ;;  %v164_v25 = vsel %vm121_vm0, %v119_v17, 0.0  ;;  %v125_v26 = vrot.slane %v124_v18, 2  ;;  %v146_v27 = vrot.slane %v145_v19, 2 }
 0x114   :  { %v140_v28 = vadd.f32 %v139_v20, %v138_v63  ;;  %v160_v29 = vrot.slane %v159_v21, 2  ;;  %v153_v30 = vrot.slane %v152_v22, 2  ;;  %v172_v31 = vrot.slane %v171_v24, 4  ;;  %v180_v41 = vpop.permute.xlu1 %179  ;;  %v232_v16 = vpop.permute.xlu0 %231 }
 0x115   :  { %v165_v32 = vrot.slane %v164_v25, 4  ;;  %v133_v33 = vadd.f32 %v132_v23, %v131_v15  ;;  %v126_v34 = vadd.f32 %v125_v26, %v124_v18  ;;  %v147_v35 = vadd.f32 %v146_v27, %v145_v19 }
 0x116   :  { %v141_v36 = vrot.slane %v140_v28, 1  ;;  %v161_v37 = vadd.f32 %v160_v29, %v159_v21  ;;  %v154_v38 = vadd.f32 %v153_v30, %v152_v22  ;;  %v173_v39 = vadd.f32 %v172_v31, %v171_v24 }
 0x117   :  { %v166_v40 = vadd.f32 %v165_v32, %v164_v25  ;;  %v134_v42 = vrot.slane %v133_v33, 1  ;;  %v127_v43 = vrot.slane %v126_v34, 1  ;;  %v148_v44 = vrot.slane %v147_v35, 1 }
 0x118   :  { %v142_v45 = vadd.f32 %v141_v36, %v140_v28  ;;  %v162_v46 = vrot.slane %v161_v37, 1  ;;  %v155_v47 = vrot.slane %v154_v38, 1  ;;  %v174_v48 = vrot.slane %v173_v39, 2 }
 0x119   :  { %v167_v49 = vrot.slane %v166_v40, 2  ;;  %v135_v50 = vadd.f32 %v134_v42, %v133_v33  ;;  %v128_v51 = vadd.f32 %v127_v43, %v126_v34  ;;  %v149_v52 = vadd.f32 %v148_v44, %v147_v35 }
 0x11a   :  { %v163_v53 = vadd.f32 %v162_v46, %v161_v37  ;;  %v156_v54 = vadd.f32 %v155_v47, %v154_v38  ;;  %v175_v55 = vadd.f32 %v174_v48, %v173_v39  ;;  %v184_v56 = vadd.f32 %v180_v41, %v142_v45 }
 0x11b   :  { %v168_v57 = vadd.f32 %v167_v49, %v166_v40  ;;  %v183_v58 = vadd.f32 %v180_v41, %v135_v50  ;;  %v182_v59 = vadd.f32 %v180_v41, %v128_v51  ;;  %v185_v60 = vadd.f32 %v180_v41, %v149_v52 }
 0x11c   :  { %v176_v61 = vrot.slane %v175_v55, 1  ;;  %v192_v62 = vmax.f32 %v184_v56, 0.0  ;;  %v186_v63 = vadd.f32 %v180_v41, %v156_v54  ;;  %v187_v14 = vadd.f32 %v180_v41, %v163_v53 }
 0x11d   :  { %v169_v3 = vrot.slane %v168_v57, 1  ;;  %v191_v7 = vmax.f32 %v183_v58, 0.0  ;;  %v190_v8 = vmax.f32 %v182_v59, 0.0  ;;  %v193_v19 = vmax.f32 %v185_v60, 0.0 }
 0x11e   :  { %v177_v15 = vadd.f32 %v176_v61, %v175_v55  ;;  %v209_v17 = vrot.slane %v192_v62, %v636_v11  ;;  %v194_v18 = vmax.f32 %v186_v63, 0.0  ;;  %v195_v29 = vmax.f32 %v187_v14, 0.0 }
 0x11f   :  { %v170_v20 = vadd.f32 %v169_v3, %v168_v57  ;;  %v205_v21 = vrot.slane %v191_v7, %v636_v11  ;;  %v201_v22 = vrot.slane %v190_v8, %v636_v11  ;;  %v213_v28 = vrot.slane %v193_v19, %v636_v11 }
 0x120   :  { %v217_v23 = vrot.slane %v194_v18, %v636_v11  ;;  %v236_v27 = vmul.f32 %v232_v16, %v209_v17  ;;  %v189_v30 = vadd.f32 %v180_v41, %v177_v15  ;;  %v221_v37 = vrot.slane %v195_v29, %v636_v11 }
 0x121   :  { %v235_v24 = vmul.f32 %v232_v16, %v205_v21  ;;  %v234_v25 = vmul.f32 %v232_v16, %v201_v22  ;;  %v188_v26 = vadd.f32 %v180_v41, %v170_v20  ;;  %v237_v36 = vmul.f32 %v232_v16, %v213_v28 }
 0x122   :  { %v238_v33 = vmul.f32 %v232_v16, %v217_v23  ;;  %v249_v38 = vsel %vm242_vm1, %v236_v27, 0.0  ;;  %v197_v42 = vmax.f32 %v189_v30, 0.0  ;;  %v239_v44 = vmul.f32 %v232_v16, %v221_v37 }
 0x123   :  { %v246_v31 = vsel %vm242_vm1, %v235_v24, 0.0  ;;  %v243_v32 = vsel %vm242_vm1, %v234_v25, 0.0  ;;  %v196_v34 = vmax.f32 %v188_v26, 0.0  ;;  %v252_v41 = vsel %vm242_vm1, %v237_v36, 0.0 }
 0x124   :  { %247 = vadd.xlane.f32.xlu0 %v246_v31  ;;  %244 = vadd.xlane.f32.xlu1 %v243_v32  ;;  %v255_v39 = vsel %vm242_vm1, %v238_v33, 0.0  ;;  %v229_v45 = vrot.slane %v197_v42, %v636_v11  ;;  %v258_v46 = vsel %vm242_vm1, %v239_v44, 0.0  ;;  %v564_v49 = vmov 0  }
 0x125   :  { %v225_v35 = vrot.slane %v196_v34, %v636_v11  ;;  %543 = vset.pattern.permute.xlu1 %v564_v49  ;;  %542 = vset.pattern.permute.xlu0 %v564_v49  ;;  %v321_v21 = vand.u32 127, %v49_v9 }
 0x126   :  { %v241_v47 = vmul.f32 %v232_v16, %v229_v45 }
 0x127   :  { %v240_v40 = vmul.f32 %v232_v16, %v225_v35  ;;  %v322_v23 = vadd.s32 4294967270, %v321_v21  ;;  %v385_v24 = vadd.s32 4294967267, %v321_v21  ;;  %v441_v26 = vadd.s32 4294967264, %v321_v21 }
 0x128   :  { %250 = vadd.xlane.f32.xlu0 %v249_v38  ;;  %256 = vadd.xlane.f32.xlu1 %v255_v39  ;;  %v264_v48 = vsel %vm242_vm1, %v241_v47, 0.0 }
 0x129   :  { %v261_v43 = vsel %vm242_vm1, %v240_v40, 0.0  ;;  %v325_v27 = vsub.s32 %v322_v23, %v633_v10  ;;  %v388_v28 = vsub.s32 %v385_v24, %v633_v10  ;;  %v444_v31 = vsub.s32 %v441_v26, %v633_v10 }
 0x12c   :  { %253 = vadd.xlane.f32.xlu0 %v252_v41  ;;  %262 = vadd.xlane.f32.xlu1 %v261_v43 }
 0x130   :  { %259 = vadd.xlane.f32.xlu0 %v258_v46 }
 0x134   :  { %265 = vadd.xlane.f32.xlu0 %v264_v48 }
 0x13d   :  { %269 = vbcast.lane.b32.xlu1 %v645_v13, 279 }
 0x1ad   :  { %v245_v50 = vpop.xlane.xlu1 %244  ;;  %v248_v52 = vpop.xlane.xlu0 %247 }
 0x1b1   :  { %v257_v51 = vpop.xlane.xlu1 %256  ;;  %v251_v54 = vpop.xlane.xlu0 %250 }
 0x1b5   :  { %v263_v53 = vpop.xlane.xlu1 %262  ;;  %v254_v60 = vpop.xlane.xlu0 %253 }
 0x1b9   :  { %v270_v11 = vpop.permute.xlu1 %269  ;;  %v260_v13 = vpop.xlane.xlu0 %259 }
 0x1ba   :  { %v273_v55 = vadd.f32 %v270_v11, %v248_v52  ;;  %v272_v56 = vadd.f32 %v270_v11, %v245_v50  ;;  %v274_v59 = vadd.f32 %v270_v11, %v251_v54  ;;  %v275_v62 = vadd.f32 %v270_v11, %v254_v60 }
 0x1bb   :  { %v276_v3 = vadd.f32 %v270_v11, %v257_v51  ;;  %v277_v8 = vadd.f32 %v270_v11, %v260_v13  ;;  %v278_v15 = vadd.f32 %v270_v11, %v263_v53 }
 0x1bc   :  { %v281_v57 = vmax.f32 %v273_v55, 0.0  ;;  %v280_v58 = vmax.f32 %v272_v56, 0.0  ;;  %v282_v61 = vmax.f32 %v274_v59, 0.0  ;;  %v283_v63 = vmax.f32 %v275_v62, 0.0 }
 0x1bd   :  { %v284_v7 = vmax.f32 %v276_v3, 0.0  ;;  %v285_v14 = vmax.f32 %v277_v8, 0.0  ;;  %v266_v16 = vpop.xlane.xlu0 %265  ;;  %v286_v18 = vmax.f32 %v278_v15, 0.0 }
 0x1be   :  { %300 = vperm.xlu1 %543, %v281_v57   ;;  %297 = vperm.xlu0 %542, %v280_v58   ;;  %v279_v17 = vadd.f32 %v270_v11, %v266_v16 }
 0x1c0   :  { %v287_v19 = vmax.f32 %v279_v17, 0.0 }
 0x1c2   :  { %303 = vperm.xlu1 %543, %v282_v61  }
 0x1c6   :  { %306 = vperm.xlu1 %543, %v283_v63  }
 0x1ca   :  { %309 = vperm.xlu1 %543, %v284_v7  }
 0x1ce   :  { %312 = vperm.xlu1 %543, %v285_v14  }
 0x1d2   :  { %315 = vperm.xlu1 %543, %v286_v18  }
 0x1d6   :  { %318 = vperm.xlu1 %543, %v287_v19  }
 0x239   :  { %v301_v20 = vpop.permute.xlu1 %300  ;;  %v298_v29 = vpop.permute.xlu0 %297 }
 0x23a   :  { %v330_v32 = vrot.slane %v301_v20, %v325_v27  ;;  %v326_v33 = vrot.slane %v298_v29, %v325_v27  ;;  %v393_v34 = vrot.slane %v301_v20, %v388_v28  ;;  %v389_v35 = vrot.slane %v298_v29, %v388_v28 }
 0x23b   :  { %v449_v36 = vrot.slane %v301_v20, %v444_v31  ;;  %v445_v37 = vrot.slane %v298_v29, %v444_v31 }
 0x23c   :  { %v356_v42 = vsel %vm355_vm2, %v330_v32, %v326_v33  ;;  %v418_v44 = vsel %vm355_vm2, %v393_v34, %v389_v35  ;;  %v568_v32 = vmov 36   ;;  %v569_v33 = vmov 35  }
 0x23d   :  { %v304_v22 = vpop.permute.xlu1 %303  ;;  %v474_v49 = vsel %vm355_vm2, %v449_v36, %v445_v37  ;;  %545 = vset.pattern.permute.xlu1 %v568_v32  ;;  %544 = vset.pattern.permute.xlu0 %v569_v33 }
 0x23e   :  { %v334_v38 = vrot.slane %v304_v22, %v325_v27  ;;  %v397_v39 = vrot.slane %v304_v22, %v388_v28  ;;  %v453_v10 = vrot.slane %v304_v22, %v444_v31 }
 0x240   :  { %v358_v50 = vsel %vm357_vm3, %v334_v38, %v356_v42  ;;  %v419_v51 = vsel %vm357_vm3, %v397_v39, %v418_v44  ;;  %v475_v56 = vsel %vm357_vm3, %v453_v10, %v474_v49 }
 0x241   :  { %v307_v25 = vpop.permute.xlu1 %306 }
 0x242   :  { %v338_v40 = vrot.slane %v307_v25, %v325_v27  ;;  %v401_v41 = vrot.slane %v307_v25, %v388_v28  ;;  %v457_v45 = vrot.slane %v307_v25, %v444_v31 }
 0x244   :  { %v360_v53 = vsel %vm359_vm4, %v338_v40, %v358_v50  ;;  %v420_v57 = vsel %vm359_vm4, %v401_v41, %v419_v51  ;;  %v476_v60 = vsel %vm359_vm4, %v457_v45, %v475_v56  ;;  %v570_v50 = vmov 37  }
 0x245   :  { %v310_v30 = vpop.permute.xlu1 %309 }
 0x246   :  { %v342_v43 = vrot.slane %v310_v30, %v325_v27  ;;  %v405_v46 = vrot.slane %v310_v30, %v388_v28  ;;  %v461_v54 = vrot.slane %v310_v30, %v444_v31 }
 0x248   :  { %v362_v58 = vsel %vm361_vm5, %v342_v43, %v360_v53  ;;  %v421_v61 = vsel %vm361_vm5, %v405_v46, %v420_v57  ;;  %v477_v15 = vsel %vm361_vm5, %v461_v54, %v476_v60 }
 0x249   :  { %v313_v9 = vpop.permute.xlu1 %312 }
 0x24a   :  { %v346_v47 = vrot.slane %v313_v9, %v325_v27  ;;  %v409_v52 = vrot.slane %v313_v9, %v388_v28  ;;  %v465_v59 = vrot.slane %v313_v9, %v444_v31 }
 0x24c   :  { %v364_v62 = vsel %vm363_vm6, %v346_v47, %v362_v58  ;;  %v422_v13 = vsel %vm363_vm6, %v409_v52, %v421_v61  ;;  %v478_v18 = vsel %vm363_vm6, %v465_v59, %v477_v15 }
 0x24d   :  { %v316_v48 = vpop.permute.xlu1 %315 }
 0x24e   :  { %v350_v11 = vrot.slane %v316_v48, %v325_v27  ;;  %v413_v55 = vrot.slane %v316_v48, %v388_v28  ;;  %v469_v63 = vrot.slane %v316_v48, %v444_v31 }
 0x250   :  { %v423_v16 = vsel %vm365_vm7, %v413_v55, %v422_v13  ;;  %v366_v17 = vsel %vm365_vm7, %v350_v11, %v364_v62  ;;  %v479_v23 = vsel %vm365_vm7, %v469_v63, %v478_v18 }
 0x251   :  { %v319_v3 = vpop.permute.xlu1 %318 }
 0x252   :  { %v354_v7 = vrot.slane %v319_v3, %v325_v27  ;;  %v417_v8 = vrot.slane %v319_v3, %v388_v28  ;;  %v473_v14 = vrot.slane %v319_v3, %v444_v31 }
 0x254   :  { %v424_v19 = vsel %vm367_vm8, %v417_v8, %v423_v16  ;;  %v368_v20 = vsel %vm367_vm8, %v354_v7, %v366_v17  ;;  %v480_v24 = vsel %vm367_vm8, %v473_v14, %v479_v23 }
 0x255   :  { %v426_v21 = vmul.f32 %v424_v19, %v641_v12  ;;  %v370_v22 = vmul.f32 %v368_v20, %v641_v12  ;;  %v482_v25 = vmul.f32 %v480_v24, %v641_v12 }
 0x257   :  { %428 = vrot.lane.b32.xlu0 %v426_v21, %s565_s29  ;;  %372 = vrot.lane.b32.xlu1 %v370_v22, %s566_s30 }
 0x25b   :  { %484 = vrot.lane.b32.xlu1 %v482_v25, %s567_s5 }
 0x2c9   :  { %v429_v26 = vpop.permute.xlu0 %428  ;;  %v373_v27 = vpop.permute.xlu1 %372 }
 0x2ca   :  { %v431_v28 = vsel %vm121_vm0, %v429_v26, 0.0  ;;  %v375_v29 = vsel %vm121_vm0, %v373_v27, 0.0 }
 0x2cb   :  { %432 = vadd.xlane.f32.xlu1 %v431_v28  ;;  %376 = vadd.xlane.f32.xlu0 %v375_v29 }
 0x2cd   :  { %v485_v30 = vpop.permute.xlu1 %484 }
 0x2ce   :  { %v487_v31 = vsel %vm121_vm0, %v485_v30, 0.0 }
 0x2cf   :  { %488 = vadd.xlane.f32.xlu0 %v487_v31 }
 0x354   :  { %v377_v34 = vpop.xlane.xlu0 %376  ;;  %v433_v35 = vpop.xlane.xlu1 %432 }
 0x355   :  { %v378_v9 = vadd.f32 %v377_v34, %v641_v12  ;;  %v434_v36 = vadd.f32 %v433_v35, %v641_v12 }
 0x357   :  { %v528_v37 = vmul.f32 -1.442695, %v378_v9  ;;  %v529_v38 = vmul.f32 -1.442695, %v434_v36 }
 0x358   :  { %v489_v39 = vpop.xlane.xlu0 %488 }
 0x359   :  { %548 = vpow2.f32 %v528_v37  ;;  %v490_v40 = vadd.f32 %v489_v39, %v641_v12 }
 0x35a   :  { %550 = vpow2.f32 %v529_v38 }
 0x35b   :  { %v530_v42 = vmul.f32 -1.442695, %v490_v40 }
 0x35d   :  { %552 = vpow2.f32 %v530_v42 }
 0x366   :  { %v549_v10 = vpop.eup %548 }
 0x367   :  { %v551_v41 = vpop.eup %550  ;;  %v382_v43 = vadd.f32 1.0, %v549_v10 }
 0x368   :  { %v438_v44 = vadd.f32 1.0, %v551_v41 }
 0x369   :  { %554 = vrcp.f32 %v382_v43 }
 0x36a   :  { %v553_v45 = vpop.eup %552  ;;  %556 = vrcp.f32 %v438_v44 }
 0x36b   :  { %v494_v46 = vadd.f32 1.0, %v553_v45 }
 0x36d   :  { %558 = vrcp.f32 %v494_v46 }
 0x376   :  { %v555_v47 = vpop.eup %554 }
 0x377   :  { %v557_v48 = vpop.eup %556  ;;  %499 = vperm.xlu0 %544, %v555_v47  }
 0x378   :  { %506 = vperm.xlu1 %545, %v557_v48  }
 0x37a   :  { %v559_v49 = vpop.eup %558 }
 0x37b   :  { %547 = vset.pattern.permute.xlu0 %v570_v50 }
 0x37c   :  { %546 = vset.pattern.permute.xlu1 %v570_v50 }
 0x37d   :  { %515 = vperm.xlu1 %546, %v559_v49  }
 0x3f2   :  { %v500_v12 = vpop.permute.xlu0 %499 }
 0x3f3   :  { %v507_v51 = vpop.permute.xlu1 %506  ;;  %v502_v52 = vmul.f32 %v500_v12, %v621_v5  ;;  %v503_v53 = vmul.f32 %v500_v12, %v626_v6 }
 0x3f4   :  { %v509_v54 = vmul.f32 %v507_v51, %v599_v0  ;;  %v510_v11 = vmul.f32 %v507_v51, %v604_v1 }
 0x3f6   :  { %v511_v56 = vadd.f32 %v509_v54, %v502_v52  ;;  %v512_v57 = vadd.f32 %v510_v11, %v503_v53 }
 0x3f8   :  { %v516_v55 = vpop.permute.xlu1 %515 }
 0x3f9   :  { %v518_v58 = vmul.f32 %v516_v55, %v609_v2  ;;  %v519_v59 = vmul.f32 %v516_v55, %v616_v4 }
 0x3fb   :  { %v520_v60 = vadd.f32 %v518_v58, %v511_v56  ;;  %v521_v61 = vadd.f32 %v519_v59, %v512_v57 }
 0x3fd   :  { %522 = vst [vmem:[%s742_s4] sm:$0xff] %v520_v60  ;;  %523 = vst [vmem:[%s742_s4 + $0x8] sm:$0xff] %v521_v61 }

</bundles_post_ra>
